<compile_context>
chip_gen: v7x
topology: tpu7x:2x2x1
jax: 0.10.0
libtpu: 0.0.40
codegen_flags: <defaults>
</compile_context>

<pallas_src>
import jax
import jax.numpy as jnp
from jax import lax
from jax.experimental import pallas as pl
from jax.experimental.pallas import tpu as pltpu


def temporal_kernel(x_ref, w_ref, b_ref, o_ref):
    """One batch-group step.

    x_ref: (GB, T+2, Cin)   zero-padded inputs (compute dtype)
    w_ref: (3,  Cin, Cout)  conv taps, tap-major (resident in VMEM)
    b_ref: (1,  Cout)       f32 bias (resident in VMEM)
    o_ref: (GB, T,   Cout)  output tile, final layout
    """
    gb, t, _ = o_ref.shape
    # Hoist loop-invariant loads (weights / bias) out of the per-batch loop.
    w0 = w_ref[0]
    w1 = w_ref[1]
    w2 = w_ref[2]
    bias = b_ref[...]                      # (1, Cout) f32, broadcasts over rows

    def one_batch(g):
        xg = x_ref[g]                      # (T+2, Cin)
        # y[t] = x_pad[t] @ W0 + x_pad[t+1] @ W1 + x_pad[t+2] @ W2  (f32 accum)
        acc = jnp.dot(xg[0:t], w0, preferred_element_type=jnp.float32)
        acc = acc + jnp.dot(xg[1:t + 1], w1, preferred_element_type=jnp.float32)
        acc = acc + jnp.dot(xg[2:t + 2], w2, preferred_element_type=jnp.float32)
        o_ref[g] = jnp.maximum(acc + bias, 0.0).astype(o_ref.dtype)

    if gb <= 8:
        # Short static trip count: unroll at trace time.
        for g in range(gb):
            one_batch(g)
    else:
        def body(g, carry):
            one_batch(g)
            return carry
        lax.fori_loop(0, gb, body, 0)


def _pick_group_size(B, T, Cin, Cout, x_item, out_item, w_item,
                     vmem_budget=40 << 20, rows_per_step=2048):
    """Batches per grid step: VMEM-budgeted, overhead-amortizing, divisor of B."""
    # Double-buffered x and out tiles per batch.
    per_b = 2 * (T + 2) * Cin * x_item + 2 * T * Cout * out_item
    # Resident weights/bias (conservatively counted double-buffered) + slack.
    fixed = 2 * 3 * Cin * Cout * w_item + 2 * 4 * Cout + (1 << 20)
    avail = max(vmem_budget - fixed, per_b)
    gb = min(B, max(1, avail // per_b), max(1, rows_per_step // max(T, 1)))
    if B >= 2:
        gb = min(gb, B // 2)      # >= 2 grid steps -> both v7x TensorCores busy
    gb = max(1, int(gb))
    while B % gb:                 # largest divisor of B <= gb (no row padding)
        gb -= 1
    return gb


def temporal_forward(x, weight, bias, *, compute_dtype=jnp.bfloat16,
                     out_dtype=None):
    """x: (B, T, Cin); weight: (Cout, Cin, 3) PyTorch Conv1d layout; bias: (Cout,)."""
    B, T, Cin = x.shape
    Cout = weight.shape[0]
    out_dtype = x.dtype if out_dtype is None else out_dtype

    # Zero-pad T by 1 on each side; cast first so the pad fusion moves narrow data.
    x_pad = jnp.pad(x.astype(compute_dtype), ((0, 0), (1, 1), (0, 0)))  # (B, T+2, Cin)
    # PyTorch (Cout, Cin, 3) -> tap-major (3, Cin, Cout): W_k[c, o] = w[o, c, k].
    w_arr = jnp.transpose(weight, (2, 1, 0)).astype(compute_dtype)      # (3, Cin, Cout)
    b_arr = bias.astype(jnp.float32).reshape(1, Cout)

    x_item = jnp.dtype(compute_dtype).itemsize
    o_item = jnp.dtype(out_dtype).itemsize
    gb = _pick_group_size(B, T, Cin, Cout, x_item, o_item, x_item)
    grid = (B // gb,)

    # Actual VMEM footprint of this tiling (double-buffered in/out + weights).
    need = (2 * gb * (T + 2) * Cin * x_item
            + 2 * gb * T * Cout * o_item
            + 2 * 3 * Cin * Cout * x_item
            + 4 * Cout)

    cost = pl.CostEstimate(
        flops=2 * B * T * 3 * Cin * Cout,
        transcendentals=0,
        bytes_accessed=(x_pad.size * x_item + w_arr.size * x_item
                        + b_arr.size * 4 + B * T * Cout * o_item),
    )

    out = pl.pallas_call(
        temporal_kernel,
        out_shape=jax.ShapeDtypeStruct((B, T, Cout), out_dtype),
        grid=grid,
        in_specs=[
            pl.BlockSpec((gb, T + 2, Cin), lambda i: (i, 0, 0)),
            pl.BlockSpec((3, Cin, Cout), lambda i: (0, 0, 0)),   # resident weights
            pl.BlockSpec((1, Cout), lambda i: (0, 0)),           # resident bias
        ],
        out_specs=pl.BlockSpec((gb, T, Cout), lambda i: (i, 0, 0)),
        compiler_params=pltpu.CompilerParams(
            dimension_semantics=("parallel",),
            vmem_limit_bytes=int(need) + (8 << 20)),
        cost_estimate=cost,
    )(x_pad, w_arr, b_arr)
    return out


def temporal_reference(x, weight, bias):
    """Pure-JAX f32 reference mirroring nn.Conv1d(k=3, s=1, p=1) + ReLU on NCT layout."""
    x_nct = jnp.transpose(x, (0, 2, 1))  # (B, Cin, T)
    out = lax.conv_general_dilated(
        x_nct, weight, window_strides=(1,), padding=((1, 1),),
        dimension_numbers=("NCH", "OIH", "NCH"),
        precision=lax.Precision.HIGHEST)
    out = jnp.maximum(out + bias[None, :, None], 0.0)
    return jnp.transpose(out, (0, 2, 1))  # (B, T, Cout)


if __name__ == "__main__":
    key = jax.random.PRNGKey(0)
    B, T = 2, 8
    input_size, out_size = 32, 32

    kx, kw, kb = jax.random.split(key, 3)
    x = jax.random.normal(kx, (B, T, input_size), dtype=jnp.float32)

    # Deterministic init matching PyTorch Conv1d default bound 1/sqrt(Cin*k).
    bound = 1.0 / jnp.sqrt(jnp.float32(input_size * 3))
    weight = jax.random.uniform(kw, (out_size, input_size, 3),
                                minval=-bound, maxval=bound, dtype=jnp.float32)
    bias = jax.random.uniform(kb, (out_size,),
                              minval=-bound, maxval=bound, dtype=jnp.float32)

    y_ref = temporal_reference(x, weight, bias)

    # Default path: bf16 operands, f32 accumulation (MXU native).
    y = temporal_forward(x, weight, bias)
    jax.block_until_ready(y)
    assert y.shape == (B, T, out_size)
    assert jnp.allclose(y, y_ref, atol=2e-2, rtol=2e-2), "bf16 path mismatch"

    # Explicit full-precision operand path (addresses silent-downcast concern).
    y32 = temporal_forward(x, weight, bias, compute_dtype=jnp.float32)
    jax.block_until_ready(y32)
    assert jnp.allclose(y32, y_ref, atol=2e-2, rtol=2e-2), "f32 path mismatch"

    print("KERNEL_OK")
</pallas_src>

<mosaic_0001>
module attributes {stable_mosaic.version = 11 : i64} {
  func.func @temporal_kernel(%arg0: i32, %arg1: memref<1x10x32xbf16, #tpu.memory_space<vmem>>, %arg2: memref<3x32x32xbf16, #tpu.memory_space<vmem>>, %arg3: memref<1x32xf32, #tpu.memory_space<vmem>>, %arg4: memref<1x8x32xf32, #tpu.memory_space<vmem>>) attributes {dimension_semantics = [#tpu.dimension_semantics<parallel>], iteration_bounds = array<i64: 2>, scalar_prefetch = 0 : i64, scratch_operands = 0 : i64, tpu.core_type = #tpu.core_type<tc>, window_params = [{transform_indices = @transform_0, window_bounds = array<i64: 1, 10, 32>}, {pipeline_mode = #tpu.pipeline_mode<synchronous>, transform_indices = @transform_1, window_bounds = array<i64: 3, 32, 32>}, {pipeline_mode = #tpu.pipeline_mode<synchronous>, transform_indices = @transform_2, window_bounds = array<i64: 1, 32>}, {transform_indices = @transform_3, window_bounds = array<i64: 1, 8, 32>}]} {
    %c0 = arith.constant 0 : index
    %c0_0 = arith.constant 0 : index
    %c0_1 = arith.constant 0 : index
    %0 = vector.load %arg2[%c0, %c0_0, %c0_1] : memref<3x32x32xbf16, #tpu.memory_space<vmem>>, vector<1x32x32xbf16>
    %1 = vector.shape_cast %0 : vector<1x32x32xbf16> to vector<32x32xbf16>
    %c1 = arith.constant 1 : index
    %c0_2 = arith.constant 0 : index
    %c0_3 = arith.constant 0 : index
    %2 = vector.load %arg2[%c1, %c0_2, %c0_3] : memref<3x32x32xbf16, #tpu.memory_space<vmem>>, vector<1x32x32xbf16>
    %3 = vector.shape_cast %2 : vector<1x32x32xbf16> to vector<32x32xbf16>
    %c2 = arith.constant 2 : index
    %c0_4 = arith.constant 0 : index
    %c0_5 = arith.constant 0 : index
    %4 = vector.load %arg2[%c2, %c0_4, %c0_5] : memref<3x32x32xbf16, #tpu.memory_space<vmem>>, vector<1x32x32xbf16>
    %5 = vector.shape_cast %4 : vector<1x32x32xbf16> to vector<32x32xbf16>
    %c0_6 = arith.constant 0 : index
    %c0_7 = arith.constant 0 : index
    %6 = vector.load %arg3[%c0_6, %c0_7] : memref<1x32xf32, #tpu.memory_space<vmem>>, vector<1x32xf32>
    %c0_8 = arith.constant 0 : index
    %c0_9 = arith.constant 0 : index
    %c0_10 = arith.constant 0 : index
    %7 = vector.load %arg1[%c0_8, %c0_9, %c0_10] : memref<1x10x32xbf16, #tpu.memory_space<vmem>>, vector<1x10x32xbf16>
    %8 = vector.shape_cast %7 : vector<1x10x32xbf16> to vector<10x32xbf16>
    %9 = vector.extract_strided_slice %8 {offsets = [0, 0], sizes = [8, 32], strides = [1, 1]} : vector<10x32xbf16> to vector<8x32xbf16>
    %cst = arith.constant dense<0.000000e+00> : vector<8x32xf32>
    %10 = tpu.matmul %9, %1, %cst {dimension_numbers = #tpu.dot_dimension_numbers<[1], [0], [0], [1], [0, 0, 1, 1], [], []>} : vector<8x32xbf16>, vector<32x32xbf16>, vector<8x32xf32> -> vector<8x32xf32>
    %11 = vector.extract_strided_slice %8 {offsets = [1, 0], sizes = [8, 32], strides = [1, 1]} : vector<10x32xbf16> to vector<8x32xbf16>
    %cst_11 = arith.constant dense<0.000000e+00> : vector<8x32xf32>
    %12 = tpu.matmul %11, %3, %cst_11 {dimension_numbers = #tpu.dot_dimension_numbers<[1], [0], [0], [1], [0, 0, 1, 1], [], []>} : vector<8x32xbf16>, vector<32x32xbf16>, vector<8x32xf32> -> vector<8x32xf32>
    %13 = arith.addf %10, %12 : vector<8x32xf32>
    %14 = vector.extract_strided_slice %8 {offsets = [2, 0], sizes = [8, 32], strides = [1, 1]} : vector<10x32xbf16> to vector<8x32xbf16>
    %cst_12 = arith.constant dense<0.000000e+00> : vector<8x32xf32>
    %15 = tpu.matmul %14, %5, %cst_12 {dimension_numbers = #tpu.dot_dimension_numbers<[1], [0], [0], [1], [0, 0, 1, 1], [], []>} : vector<8x32xbf16>, vector<32x32xbf16>, vector<8x32xf32> -> vector<8x32xf32>
    %16 = arith.addf %13, %15 : vector<8x32xf32>
    %17 = vector.broadcast %6 : vector<1x32xf32> to vector<8x32xf32>
    %18 = arith.addf %16, %17 : vector<8x32xf32>
    %cst_13 = arith.constant 0.000000e+00 : f32
    %19 = vector.broadcast %cst_13 : f32 to vector<8x32xf32>
    %20 = arith.maximumf %18, %19 : vector<8x32xf32>
    %c0_14 = arith.constant 0 : index
    %c0_15 = arith.constant 0 : index
    %c0_16 = arith.constant 0 : index
    %21 = vector.load %arg4[%c0_14, %c0_15, %c0_16] : memref<1x8x32xf32, #tpu.memory_space<vmem>>, vector<1x8x32xf32>
    %22 = vector.shape_cast %21 : vector<1x8x32xf32> to vector<8x32xf32>
    %23 = vector.shape_cast %20 : vector<8x32xf32> to vector<1x8x32xf32>
    tpu.vector_store %arg4[%c0_14, %c0_15, %c0_16], %23 {strides = array<i32>} : memref<1x8x32xf32, #tpu.memory_space<vmem>>, vector<1x8x32xf32>,
    return
  }
  func.func @transform_0(%arg0: i32) -> (i32, i32, i32) {
    %c0_i32 = arith.constant 0 : i32
    %c0_i32_0 = arith.constant 0 : i32
    %c0_i32_1 = arith.constant 0 : i32
    return %arg0, %c0_i32, %c0_i32_0 : i32, i32, i32
  }
  func.func @transform_1(%arg0: i32) -> (i32, i32, i32) {
    %c0_i32 = arith.constant 0 : i32
    %c0_i32_0 = arith.constant 0 : i32
    %c0_i32_1 = arith.constant 0 : i32
    %c0_i32_2 = arith.constant 0 : i32
    return %c0_i32, %c0_i32_0, %c0_i32_1 : i32, i32, i32
  }
  func.func @transform_2(%arg0: i32) -> (i32, i32) {
    %c0_i32 = arith.constant 0 : i32
    %c0_i32_0 = arith.constant 0 : i32
    %c0_i32_1 = arith.constant 0 : i32
    return %c0_i32, %c0_i32_0 : i32, i32
  }
  func.func @transform_3(%arg0: i32) -> (i32, i32, i32) {
    %c0_i32 = arith.constant 0 : i32
    %c0_i32_0 = arith.constant 0 : i32
    %c0_i32_1 = arith.constant 0 : i32
    return %arg0, %c0_i32, %c0_i32_0 : i32, i32, i32
  }
}

</mosaic_0001>

<bundles_post_ra>
// kernel: tpu_custom_call.1
= control target key start
LH: loop header
LB: loop body
LE: loop exit
PB: predicated region body
PF: predicated region fallthrough
CT: control target
= control target key end

     0   :  { %8 = vsyncpa [#allocation3], 0  ;;  %s862_s0 = inlined_call_operand.vmem [shape: bf16[2,10,32], index: 0, kind: input, shape index: {}]   ;;  %s863_s1 = inlined_call_operand.hbm [shape: bf16[3,32,32], index: 1, kind: input, shape index: {}]   ;;  %s864_s2 = inlined_call_operand.vmem [shape: f32[1,32], index: 2, kind: input, shape index: {}]   ;;  %s865_s3 = inlined_call_operand.hbm [shape: f32[2,8,32], index: 3, kind: output, shape index: {}]  }
   0x1   :  { %9 = vsyncpa [#allocation4], 0 }
   0x2   :  { %11 = vsyncpa [#allocation4 + $0x1], 0  ;;  %s717_s12 = smov 0   ;;  %s719_s13 = smov 0  }
   0x3   :  { %s721_s14 = smov 0   ;;  %s723_s15 = smov 0  }
   0x4 LB: > { %s738_s16 = sadd.s32 4294967295, %s689_s15   ;;  %s476_s17 = sadd.s32 4294967294, %s689_s15   ;;  %s689_s15 = sphi %s723_s15, %s881_s15   ;;  %s685_s14 = sphi %s721_s14, %s880_s14   ;;  %s681_s13 = sphi %s719_s13, %s879_s13   ;;  %s677_s12 = sphi %s717_s12, %s878_s12  }
   0x5   : > { %s742_s18 = sadd.s32 1, %s689_s15   ;;  %s92_s19 = sadd.s32 1, %s685_s14 }
   0x6   : > { %s89_s20 = ssub.s32 %s689_s15, %s742_s18  ;;  %p102_p0 = scmp.ne.s32.totalorder %s685_s14, %s681_s13 }
   0x7   : > { %p90_p1 = scmp.eq.s32.totalorder %s89_s20, 0  ;;  %p103_p2 = scmp.eq.s32.totalorder %s738_s16, 1 }
   0x8   : > { %p108_p3 = scmp.ne.s32.totalorder %s681_s13, %s677_s12  ;;  %p109_p4 = scmp.eq.s32.totalorder %s476_s17, 1 }
   0x9   : > { %s753_s21 = scalar_select %p90_p1, %s685_s14, %s92_s19  }
   0xa   : > { %p755_p5 = por %p103_p2, %p102_p0  ;;  %p759_p6 = por %p109_p4, %p108_p3 }
   0xb   : > { %p477_p7 = scmp.ge.s32.totalorder %s689_s15, 1  ;;  %p116_p8 = scmp.lt.s32.totalorder %s689_s15, 3 }
   0xc   : > { %s869_s22 = scalar_select %p755_p5, 1, 0 }
   0xd   : > { %s870_s23 = scalar_select %p759_p6, 1, 0 }
   0xe   : > { %p866_p9 = scmp.eq.s32.totalorder %s738_s16, 0  ;;  %p766_p10 = pnand %p477_p7, %p116_p8 }
   0xf   : > { %s691_s25 = smov [#allocation2]   ;;  %s595_s30 = scalar_lea.hbm %s863_s1, 768 }
  0x10   : > { %s871_s24 = scalar_select %p766_p10, 1, 0 }
  0x11   : > { %s128_s26 = sshll.u32 %s691_s25, 4  ;;  %p540_p11 = pneg %p766_p10  ;;  %s129_s26 = int_to_ptr.vmem [resolvable:$true] %s128_s26 }
  0x12   : > { %p596_p13 = scmp.ne.s32.totalorder %s863_s1, %s595_s30  ;;  %p602_p3 = scmp.lt.u32.totalorder %s595_s30, %s863_s1 }
  0x13   : > { %p774_p12 = pnand %p866_p9, %p540_p11 }
  0x15   : > { %p597_p0 = pneg %p774_p12 }
  0x17   : > { %p598_p1 = pnand %p597_p0, %p596_p13 }
  0x19   : > { %p599_p2 = pneg %p598_p1 }
  0x1b   : > { %p604_p4 = pnand %p602_p3, %p599_p2 }
  0x1d   : > { %607 = shalt.err (!%p604_p4)
}
  0x1e   : > { %s608_s8 = scalar_lea.vmem %s129_s26, 768  ;;  %p616_p9 = scmp.lt.s32.totalorder %s129_s26, %s129_s26 }
  0x1f   : > { %p609_p7 = scmp.ne.s32.totalorder %s129_s26, %s608_s8  ;;  %p617_p6 = scmp.lt.s32.totalorder %s608_s8, %s608_s8 }
  0x21   : > { %p611_p8 = pnand %p609_p7, %p597_p0  ;;  %p618_p5 = por %p617_p6, %p616_p9 }
  0x23   : > { %p612_p11 = pneg %p611_p8 }
  0x25   : > { %p619_p10 = pnand %p618_p5, %p612_p11 }
  0x27   : > { %622 = shalt.err (!%p619_p10)
}
  0x28   : > { %s692_s9 = smov 64   ;;  %s693_s10 = smov 4  }
  0x29   : > { %543 = dma.hbm_to_vmem [thread:$0]  (!%p774_p12), %s863_s1, 768, %s129_s26, [#allocation3], %s692_s9, %s692_s9, %s693_s10  }
  0x2a   : > { %p873_p13 = scmp.ne.s32.totalorder %s871_s24, 0 }
  0x2b   : > { %p874_p1 = scmp.eq.s32.totalorder (!%p873_p13), %s738_s16, 0 }
  0x2c   : > { %155 = sbr.rel (%p873_p13) target bundleno = 307 (0x133), region = 32 }
  0x33   : > { %668 = dma.done.wait (%p874_p1), [#allocation3], 768   ;;  %p875_p0 = pmov %p874_p1 }
  0x34   : > { %p179_p5 = scmp.lt.s32.totalorder %s738_s16, 1  ;;  %v694_v0 = vmov 0.0   ;;  %vm695_vm0 = vmmov 0   ;;  %v588_v1 = vld [vmem:[#allocation2 + $0x10] sm:$0xff]   ;;  %v589_v2 = vld [vmem:[#allocation2] sm:$0xff]   ;;  %v590_v3 = vld [vmem:[#allocation2 + $0x18] sm:$0xff]  }
  0x35   : > { %670 = vsyncadd (%p875_p0), [#allocation3], 4294966528  ;;  %510 = vmatprep.subr.bf16.mxu0 %v694_v0  ;;  %518 = vmatprep.subr.bf16.mxu1 %v694_v0  ;;  %v591_v4 = vld [vmem:[#allocation2 + $0x8] sm:$0xff]   ;;  %vm226_vm1 = vcmask 261120   ;;  %v593_v11 = vld [vmem:[#allocation2 + $0x20] sm:$0xff]   ;;  %s176_s27 = sand.u32 1, %s681_s13  }
  0x36   : > { %514 = vmatprep.mubr.msk.bf16.mxu0 %vm695_vm0, %v694_v0  ;;  %s180_s19 = scalar_select %p179_p5, %s738_s16, 1  ;;  %522 = vmatprep.mubr.msk.bf16.mxu1 %vm695_vm0, %v694_v0  ;;  %v594_v13 = vld [vmem:[#allocation2 + $0x28] sm:$0xff]   ;;  %v495_v24 = vld [vmem:[%s864_s2] ss:$0 sm:$0xff] }
  0x37   : > { %511 = vmatpush3.bf16.msra.mxu0 %v588_v1  ;;  %519 = vmatpush3.bf16.msra.mxu1 %v589_v2  ;;  %s482_s28 = sshll.u32 %s176_s27, 3  ;;  %s497_s4 = sshll.u32 %s738_s16, 7 }
  0x38   : > { %s500_s20 = sshll.u32 %s180_s19, 3  ;;  %512 = vmatprep.subr.bf16.mxu0 %v694_v0  ;;  %520 = vmatprep.subr.bf16.mxu1 %v694_v0  ;;  %s178_s5 = scalar_lea.vmem [#allocation5], %s482_s28 }
  0x39   : > { %s183_s26 = scalar_lea.vmem %s862_s0, %s500_s20  ;;  %s405_s6 = sshll.u32 %s178_s5, 4  ;;  %s821_s6 = int_to_ptr.vmem [resolvable:$true] %s405_s6 }
  0x3a   : > { %v200_v5 = vld [vmem:[%s183_s26] sm:$0xf]  ;;  %v201_v6 = vld [vmem:[%s183_s26 + $0x4] sm:$0x1]  ;;  %s819_s9 = scalar_lea.hbm %s865_s3, %s497_s4  ;;  %s392_s10 = scalar_lea.sflag [#allocation4], %s176_s27 }
  0x3b   : > { %v485_v7 = vcombine.low %v200_v5, %v201_v6  ;;  %513 = vmatpush3.bf16.msra.mxu0 %v590_v3  ;;  %521 = vmatpush3.bf16.msra.mxu1 %v591_v4  ;;  %s623_s11 = scalar_lea.vmem %s821_s6, 128  ;;  %p876_p9 = scmp.ne.s32.totalorder %s869_s22, 0 }
  0x3c   : > { %526 = vmatprep.subr.bf16.mxu0 %v694_v0  ;;  %p624_p6 = scmp.ne.s32.totalorder %s821_s6, %s623_s11  ;;  %s696_s16 = smov [#allocation5]  }
  0x3d   : > { %v208_v8 = vshrl.u32 %v485_v7, 16  ;;  %v210_v9 = vshll.u32 %v485_v7, 16  ;;  %v325_v14 = vrot.slane %v485_v7, 1  ;;  %s627_s17 = sshll.u32 %s696_s16, 4  ;;  %s628_s17 = int_to_ptr.vmem [resolvable:$false] %s627_s17 }
  0x3e   : > { %523 = vmatmul.mubr.msk.bf16.vlgmr.msra.gmra.mrb[0].mxu1 %vm226_vm1, %v200_v5  ;;  %p625_p10 = pnand %p624_p6, %p876_p9  ;;  %s629_s19 = scalar_lea.vmem %s628_s17, 256 }
  0x3f   : > { %v212_v10 = vrot.slane %v210_v9, 1  ;;  %p630_p2 = scmp.lt.s32.totalorder %s821_s6, %s628_s17  ;;  %p631_p3 = scmp.lt.s32.totalorder %s629_s19, %s623_s11 }
  0x40   : > { %p626_p12 = pneg %p625_p10 }
  0x41   : > { %v213_v12 = vor.u32 %v212_v10, %v208_v8  ;;  %p632_p4 = por %p631_p3, %p630_p2 }
  0x43   : > { %515 = vmatmul.mubr.msk.bf16.vlgmr.msra.gmra.mrb[0].mxu0 %vm226_vm1, %v213_v12  ;;  %p633_p7 = pnand %p632_p4, %p626_p12 }
  0x44   : > { %527 = vmatpush3.bf16.msra.mxu0 %v593_v11  ;;  %530 = vmatprep.mubr.msk.bf16.mxu0 %vm695_vm0, %v694_v0 }
  0x45   : > { %528 = vmatprep.subr.bf16.mxu0 %v694_v0 }
  0x48   : > { %529 = vmatpush3.bf16.msra.mxu0 %v594_v13 }
  0x4b   : > { %531 = vmatmul.mubr.msk.bf16.vlgmr.msra.gmra.mrb[4].mxu0 %vm226_vm1, %v325_v14 }
 0x111   : > { %v319_v15 = vpop.f32.mrb[0].mxu1 }
 0x112   : > { %v524_v16 = vpop.f32.mrb[1].mxu1 }
 0x113   : > { %v322_v17 = vpop.f32.mrb[2].mxu1 }
 0x114   : > { %v525_v19 = vpop.f32.mrb[3].mxu1 }
 0x116   : > { %v264_v18 = vpop.f32.mrb[0].mxu0 }
 0x117   : > { %v516_v20 = vpop.f32.mrb[1].mxu0  ;;  %v320_v21 = vadd.f32 %v319_v15, %v264_v18 }
 0x118   : > { %v267_v22 = vpop.f32.mrb[2].mxu0 }
 0x119   : > { %v517_v23 = vpop.f32.mrb[3].mxu0 }
 0x11e   : > { %v375_v25 = vpop.f32.mrb[4].mxu0 }
 0x11f   : > { %v381_v26 = vadd.f32 %v375_v25, %v320_v21  ;;  %v532_v27 = vpop.f32.mrb[5].mxu0 }
 0x120   : > { %v378_v28 = vpop.f32.mrb[6].mxu0 }
 0x121   : > { %v388_v29 = vadd.f32 %v495_v24, %v381_v26  ;;  %v533_v30 = vpop.f32.mrb[7].mxu0 }
 0x123   : > { %v389_v31 = vmax.f32 %v388_v29, 0.0 }
 0x125   : > { %390 = vst.msk [vmem:[%s178_s5] sm:$0xff] %vm226_vm1, %v389_v31 }
 0x126   : > { %636 = shalt.err (!%p633_p7)
}
 0x127   : > { %s637_s20 = scalar_lea.hbm %s819_s9, 128  ;;  %s641_s26 = scalar_lea.hbm %s865_s3, 256 }
 0x128   : > { %p638_p8 = scmp.ne.s32.totalorder %s819_s9, %s637_s20  ;;  %p642_p1 = scmp.lt.u32.totalorder %s819_s9, %s865_s3 }
 0x129   : > { %p643_p0 = scmp.lt.u32.totalorder %s641_s26, %s637_s20  ;;  %p645_p6 = scmp.lt.u32.totalorder %s637_s20, %s819_s9 }
 0x12a   : > { %p639_p11 = pnand %p638_p8, %p876_p9 }
 0x12b   : > { %p644_p5 = por %p643_p0, %p642_p1 }
 0x12c   : > { %p640_p13 = pneg %p639_p11 }
 0x12d   : > { %p646_p10 = por %p645_p6, %p644_p5 }
 0x12f   : > { %p647_p12 = pnand %p646_p10, %p640_p13 }
 0x131   : > { %650 = shalt.err (!%p647_p12)
}
 0x132   : > { %538 = dma.vmem_to_hbm [thread:$0]  (%p876_p9), %s821_s6, 128, %s819_s9, %s392_s10  }
 0x133 PF: > { %p550_p2 = scmp.ge.s32.totalorder %s689_s15, 2  ;;  %s417_s29 = sand.u32 1, %s677_s12  }
 0x134   : > { %p877_p3 = scmp.ne.s32.totalorder %s870_s23, 0  ;;  %s418_s30 = scalar_lea.sflag [#allocation4], %s417_s29 }
 0x136   : > { %p545_p4 = pnand %p550_p2, %p877_p3 }
 0x138   : > { %672 = dma.done.wait (!%p545_p4), %s418_s30, 128  }
 0x139   : > { %674 = vsyncadd (!%p545_p4), %s418_s30, 4294967168  ;;  %p14_p7 = scmp.ge.s32.totalorder %s742_s18, 4   ;;  %s878_s12 = smov %s681_s13 }
 0x13a   : > { %s879_s13 = smov %s685_s14  ;;  %s880_s14 = smov %s753_s21 }
 0x13b   : > { %s881_s15 = smov %s742_s18  ;;  %16 = sbr.rel (!%p14_p7) target bundleno = 4 (0x4), region = 74 }
 0x142   :  { %423 = vsyncpa [#allocation3], 1 }
 0x143   :  { %425 = vsyncpa [#allocation3 + $0x1], 1 }
 0x144   :  { %426 = vsyncpa [#allocation4], 1 }
 0x145   :  { %428 = vsyncpa [#allocation4 + $0x1], 1 }

</bundles_post_ra>
